<compile_context>
chip_gen: v5e
topology: v5e:2x2
jax: 0.10.0
libtpu: 0.0.40
codegen_flags: <defaults>
</compile_context>

<pallas_src>
import math

import jax
import jax.numpy as jnp
from jax.experimental import pallas as pl
from jax.experimental.pallas import tpu as pltpu

_GELU_C = math.sqrt(2.0 / math.pi)


def _round_up(x, m):
    return ((x + m - 1) // m) * m


def _cdiv(a, b):
    return (a + b - 1) // b


# ----------------------------- hardware probes ------------------------------
def _device_kind():
    try:
        return jax.devices()[0].device_kind.lower()
    except Exception:
        return ""


def _tpu_generation():
    kind = _device_kind()
    for g in (7, 6, 5, 4):
        if "v%d" % g in kind:
            return g
    return 0


def _vmem_capacity_bytes(gen):
    cap = None
    try:
        info = pltpu.get_tpu_info()
        cap = int(getattr(info, "vmem_capacity_bytes", 0)) or None
    except Exception:
        cap = None
    if cap is None:
        cap = (64 << 20) if gen >= 7 else (128 << 20)
    if gen >= 7:
        cap = min(cap, 64 << 20)      # v7x: 64 MiB VMEM per TensorCore
    return cap


def _pipeline_mode_supported():
    if not hasattr(pl, "Buffered"):
        return False
    try:
        pl.BlockSpec((8, 128), lambda i, j: (0, 0), pipeline_mode=pl.Buffered(1))
        return True
    except Exception:
        return False


_HAS_BUFFERED = _pipeline_mode_supported()


def _block_spec(shape, index_map, *, buffers=None):
    """BlockSpec helper; buffers=1 requests single-buffering for blocks whose
    index_map is constant (resident weights/biases)."""
    if buffers is not None and _HAS_BUFFERED:
        return pl.BlockSpec(shape, index_map, pipeline_mode=pl.Buffered(buffers))
    return pl.BlockSpec(shape, index_map)


# -------------------------------- kernels ------------------------------------
def _gelu_tanh(h, dtype):
    """GELU(approximate='tanh'); `dtype` picks the VPU/EUP precision."""
    h = h.astype(dtype)
    c = jnp.asarray(_GELU_C, dtype)
    k = jnp.asarray(0.044715, dtype)
    half = jnp.asarray(0.5, dtype)
    one = jnp.asarray(1.0, dtype)
    return half * h * (one + jnp.tanh(c * (h + k * (h * h * h))))


def _make_resident_kernel(compute_dtype, gelu_dtype):
    """Whole hidden dim resident: no accumulator scratch, direct output write."""
    def kernel(x_ref, w1_ref, b1_ref, w2_ref, b2_ref, o_ref):
        x = x_ref[...].astype(compute_dtype)          # in-kernel cast (VPU)
        h = jnp.dot(x, w1_ref[...],
                    preferred_element_type=jnp.float32) + b1_ref[...]
        h = _gelu_tanh(h, gelu_dtype)
        out = jnp.dot(h.astype(w2_ref.dtype), w2_ref[...],
                      preferred_element_type=jnp.float32) + b2_ref[...]
        o_ref[...] = out.astype(o_ref.dtype)
    return kernel


def _make_tiled_kernel(compute_dtype, gelu_dtype):
    """Hidden dim tiled in th chunks with an f32 accumulator over axis 1."""
    def kernel(x_ref, w1_ref, b1_ref, w2_ref, b2_ref, o_ref, acc_ref):
        j = pl.program_id(1)

        @pl.when(j == 0)
        def _init():
            acc_ref[...] = jnp.zeros_like(acc_ref)

        x = x_ref[...].astype(compute_dtype)
        h = jnp.dot(x, w1_ref[...],
                    preferred_element_type=jnp.float32) + b1_ref[...]
        h = _gelu_tanh(h, gelu_dtype)
        acc_ref[...] += jnp.dot(h.astype(w2_ref.dtype), w2_ref[...],
                                preferred_element_type=jnp.float32)

        @pl.when(j == pl.num_programs(1) - 1)
        def _finalize():
            o_ref[...] = (acc_ref[...] + b2_ref[...]).astype(o_ref.dtype)
    return kernel


# ---------------------------- tiling / budgeting ------------------------------
def _vmem_need_bytes(tm, C, H, th, xb, cb, ob, resident):
    """Rough VMEM demand for one pipelined grid step (bytes)."""
    wbuf = 1 if (resident and _HAS_BUFFERED) else 2
    need = (2 * tm * C * xb          # x row tile, double-buffered (orig dtype)
            + tm * C * cb            # in-kernel cast copy of x
            + wbuf * C * th * cb     # w1 block(s)
            + wbuf * 8 * th * 4      # b1 block(s) (sublane-padded f32)
            + wbuf * th * C * cb     # w2 block(s)
            + 8 * C * 4              # b2 (f32)
            + 2 * tm * C * ob        # output tile, double-buffered
            + 3 * tm * th * 4)       # f32 (tm, th) intermediates / GELU temps
    if not resident:
        need += tm * C * 4           # f32 accumulator scratch
    return need


def _choose_tiling(M, C, H, tm_user, th_user, xb, cb, ob, gen, budget):
    stream_tm_default = {5: 512, 6: 1024, 7: 512}.get(gen, 768)

    def clamp_tm(tm):
        tm = max(8, min(int(tm), _round_up(M, 8)))
        return _round_up(tm, 8)

    # --- user-pinned hidden tile (must be a multiple of 512 dividing H) ------
    if (th_user is not None and th_user < H
            and H % th_user == 0 and th_user % 512 == 0):
        th = int(th_user)
        tm = clamp_tm(tm_user if tm_user is not None else stream_tm_default)
    else:
        # --- try resident (th = H) -------------------------------------------
        tm = clamp_tm(tm_user if tm_user is not None else 512)
        if _vmem_need_bytes(tm, C, H, H, xb, cb, ob, True) <= budget:
            th = H
        else:
            # --- stream the hidden dim: bigger rows, largest 512-multiple ----
            tm = clamp_tm(tm_user if tm_user is not None else stream_tm_default)
            cands = sorted((t for t in range(512, H, 512) if H % t == 0),
                           reverse=True)
            th = None
            for t in cands:
                if _vmem_need_bytes(tm, C, H, t, xb, cb, ob, False) <= budget:
                    th = t
                    break
            if th is None:
                cands128 = sorted((t for t in range(128, H, 128) if H % t == 0),
                                  reverse=True)
                for t in cands128:
                    if _vmem_need_bytes(tm, C, H, t, xb, cb, ob, False) <= budget:
                        th = t
                        break
                if th is None:
                    th = cands[-1] if cands else (cands128[-1] if cands128 else H)

    # --- v7x: keep both TensorCores busy on the parallel row axis ------------
    if tm_user is None and gen >= 7 and M >= 16 and _cdiv(M, tm) < 2:
        tm = clamp_tm(_round_up(_cdiv(M, 2), 8))

    return tm, th


# -------------------------------- public API ---------------------------------
def prepare_mlp_params(w_fc, b_fc, w_proj, b_proj, *, compute_dtype=jnp.bfloat16):
    """ONE-TIME conversion from PyTorch nn.Linear layout (weight=(out,in)) to
    kernel layout.  Cache the result; the per-call hot path then does no HBM
    weight transposes or casts.  compute_dtype=bf16 is recommended on TPU."""
    w1 = jnp.asarray(w_fc).T.astype(compute_dtype)            # (C, H)
    w2 = jnp.asarray(w_proj).T.astype(compute_dtype)          # (H, C)
    b1 = jnp.asarray(b_fc, jnp.float32).reshape(1, -1)        # (1, H)
    b2 = jnp.asarray(b_proj, jnp.float32).reshape(1, -1)      # (1, C)
    return w1, b1, w2, b2


def mlp_pallas(x, w1, b1, w2, b2, *, tm=None, th=None,
               compute_dtype=jnp.bfloat16, gelu_in_low_precision=None,
               vmem_limit_bytes=None):
    """Fused MLP forward: x @ w1 + b1 -> GELU(tanh) -> @ w2 + b2.

    x: (B, T, C).  w1: (C, H), b1: (1, H), w2: (H, C), b2: (1, C) as produced
    by prepare_mlp_params.  tm / th default to generation-aware choices;
    compute_dtype sets the MXU operand dtype (accumulation is always f32)."""
    B, T, C = x.shape
    Cw, H = w1.shape
    assert Cw == C and w2.shape == (H, C), "weight shapes must match x"
    out_dtype = x.dtype
    compute_dtype = jnp.dtype(compute_dtype)

    gen = _tpu_generation()
    vmem_cap = _vmem_capacity_bytes(gen)
    budget = int(vmem_cap * 0.80)               # headroom for compiler scratch

    cb = compute_dtype.itemsize
    xb = jnp.dtype(x.dtype).itemsize
    ob = jnp.dtype(out_dtype).itemsize

    M = B * T
    tm_sel, th_sel = _choose_tiling(M, C, H, tm, th, xb, cb, ob, gen, budget)
    resident = (th_sel == H)
    n_h = H // th_sel
    M_pad = _round_up(M, tm_sel)
    n_m = M_pad // tm_sel

    # GELU precision: bf16 on v6e/v7x (bf16 VPU/EUP) when matmuls are bf16.
    if gelu_in_low_precision is None:
        gelu_in_low_precision = (gen >= 6) and (compute_dtype == jnp.dtype(jnp.bfloat16))
    gelu_dtype = jnp.bfloat16 if gelu_in_low_precision else jnp.float32

    # No-ops when prepare_mlp_params already produced these dtypes.
    w1 = jnp.asarray(w1).astype(compute_dtype)
    w2 = jnp.asarray(w2).astype(compute_dtype)
    b1 = jnp.asarray(b1, jnp.float32).reshape(1, H)
    b2 = jnp.asarray(b2, jnp.float32).reshape(1, C)

    # x stays in its original dtype in HBM; cast happens inside the kernel.
    x2d = x.reshape(M, C)
    if M_pad != M:
        x2d = jnp.pad(x2d, ((0, M_pad - M), (0, 0)))

    if vmem_limit_bytes is None:
        need = _vmem_need_bytes(tm_sel, C, H, th_sel, xb, cb, ob, resident)
        vmem_limit_bytes = min(max(need + (8 << 20), 32 << 20), budget)
    vmem_limit_bytes = int(min(vmem_limit_bytes, vmem_cap - (4 << 20)))

    w_buffers = 1 if resident else None          # constant-index -> 1 buffer
    in_specs = [
        pl.BlockSpec((tm_sel, C), lambda i, j: (i, 0)),                       # x
        _block_spec((C, th_sel), lambda i, j: (0, j), buffers=w_buffers),     # w1
        _block_spec((1, th_sel), lambda i, j: (0, j), buffers=w_buffers),     # b1
        _block_spec((th_sel, C), lambda i, j: (j, 0), buffers=w_buffers),     # w2
        _block_spec((1, C), lambda i, j: (0, 0), buffers=1),                  # b2
    ]

    if resident:
        kernel = _make_resident_kernel(compute_dtype, gelu_dtype)
        scratch_shapes = []
    else:
        kernel = _make_tiled_kernel(compute_dtype, gelu_dtype)
        scratch_shapes = [pltpu.VMEM((tm_sel, C), jnp.float32)]

    grid_spec = pltpu.PrefetchScalarGridSpec(
        num_scalar_prefetch=0,
        grid=(n_m, n_h),                         # rows parallel, reduction last
        in_specs=in_specs,
        out_specs=pl.BlockSpec((tm_sel, C), lambda i, j: (i, 0)),
        scratch_shapes=scratch_shapes,
    )

    out2d = pl.pallas_call(
        kernel,
        out_shape=jax.ShapeDtypeStruct((M_pad, C), out_dtype),
        grid_spec=grid_spec,
        compiler_params=pltpu.CompilerParams(
            dimension_semantics=("parallel", "arbitrary"),
            vmem_limit_bytes=int(vmem_limit_bytes),
        ),
    )(x2d, w1, b1, w2, b2)

    return out2d[:M].reshape(B, T, C)


def mlp_reference(x, w_fc, b_fc, w_proj, b_proj):
    """Pure-JAX reference in PyTorch layout (weight = (out, in))."""
    h = jnp.einsum("btc,hc->bth", x, w_fc) + b_fc
    h = 0.5 * h * (1.0 + jnp.tanh(_GELU_C * (h + 0.044715 * h ** 3)))
    return jnp.einsum("bth,ch->btc", h, w_proj) + b_proj


if __name__ == "__main__":
    # Small GPT-2-style config; generate_batch=5 rows of tokens (per the spec).
    B, T, C = 5, 8, 32          # n_embd = 32
    H = 4 * C                   # 128

    key = jax.random.PRNGKey(0)
    kx, k1, k2, k3, k4 = jax.random.split(key, 5)

    x = jax.random.normal(kx, (B, T, C), dtype=jnp.float32)
    # PyTorch nn.Linear layout: weight is (out_features, in_features).
    w_fc = jax.random.normal(k1, (H, C), jnp.float32) / math.sqrt(C)
    b_fc = jax.random.normal(k2, (H,), jnp.float32) * 0.02
    w_proj = jax.random.normal(k3, (C, H), jnp.float32) / math.sqrt(H)
    b_proj = jax.random.normal(k4, (C,), jnp.float32) * 0.02

    ref = mlp_reference(x, w_fc, b_fc, w_proj, b_proj)

    # --- Test 1: f32 operands (exactness of the fused math), resident path ---
    p32 = prepare_mlp_params(w_fc, b_fc, w_proj, b_proj, compute_dtype=jnp.float32)
    out_f32 = jax.block_until_ready(mlp_pallas(x, *p32, compute_dtype=jnp.float32))
    assert out_f32.shape == (B, T, C)
    assert jnp.allclose(out_f32, ref, atol=5e-4, rtol=5e-4), "mismatch (f32 path)"

    # --- Test 2: default bf16 operands (recommended fast path) ---------------
    pbf = prepare_mlp_params(w_fc, b_fc, w_proj, b_proj)        # bf16 weights
    out_bf = jax.block_until_ready(mlp_pallas(x, *pbf))         # bf16 compute
    assert out_bf.shape == (B, T, C)
    assert jnp.allclose(out_bf, ref, atol=6e-2, rtol=6e-2), "mismatch (bf16 path)"

    # --- Test 3: ragged M + hidden-dim tiling (accumulator / pl.when path) ---
    B2, T2, C2 = 3, 7, 256
    H2 = 4 * C2                 # 1024 -> two th=512 hidden tiles
    kx2, k5, k6, k7, k8 = jax.random.split(jax.random.PRNGKey(1), 5)
    x2 = jax.random.normal(kx2, (B2, T2, C2), dtype=jnp.float32)
    w_fc2 = jax.random.normal(k5, (H2, C2), jnp.float32) / math.sqrt(C2)
    b_fc2 = jax.random.normal(k6, (H2,), jnp.float32) * 0.02
    w_proj2 = jax.random.normal(k7, (C2, H2), jnp.float32) / math.sqrt(H2)
    b_proj2 = jax.random.normal(k8, (C2,), jnp.float32) * 0.02
    p2 = prepare_mlp_params(w_fc2, b_fc2, w_proj2, b_proj2)

    out2 = jax.block_until_ready(mlp_pallas(x2, *p2, th=512))
    ref2 = mlp_reference(x2, w_fc2, b_fc2, w_proj2, b_proj2)
    assert out2.shape == (B2, T2, C2)
    assert jnp.allclose(out2, ref2, atol=8e-2, rtol=8e-2), "mismatch (H-tiled)"

    print("KERNEL_OK")
</pallas_src>

<mosaic_0001>
module attributes {stable_mosaic.version = 11 : i64} {
  func.func @kernel(%arg0: i32, %arg1: i32, %arg2: memref<40x32xf32, #tpu.memory_space<vmem>>, %arg3: memref<32x128xf32, #tpu.memory_space<vmem>>, %arg4: memref<1x128xf32, #tpu.memory_space<vmem>>, %arg5: memref<128x32xf32, #tpu.memory_space<vmem>>, %arg6: memref<1x32xf32, #tpu.memory_space<vmem>>, %arg7: memref<40x32xf32, #tpu.memory_space<vmem>>) attributes {dimension_semantics = [#tpu.dimension_semantics<parallel>, #tpu.dimension_semantics<arbitrary>], iteration_bounds = array<i64: 1, 1>, scalar_prefetch = 0 : i64, scratch_operands = 0 : i64, tpu.core_type = #tpu.core_type<tc>, window_params = [{transform_indices = @transform_0, window_bounds = array<i64: 40, 32>}, {pipeline_mode = #tpu.pipeline_mode<synchronous>, transform_indices = @transform_1, window_bounds = array<i64: 32, 128>}, {pipeline_mode = #tpu.pipeline_mode<synchronous>, transform_indices = @transform_2, window_bounds = array<i64: 1, 128>}, {pipeline_mode = #tpu.pipeline_mode<synchronous>, transform_indices = @transform_3, window_bounds = array<i64: 128, 32>}, {pipeline_mode = #tpu.pipeline_mode<synchronous>, transform_indices = @transform_4, window_bounds = array<i64: 1, 32>}, {transform_indices = @transform_5, window_bounds = array<i64: 40, 32>}]} {
    %c0 = arith.constant 0 : index
    %c0_0 = arith.constant 0 : index
    %0 = vector.load %arg2[%c0, %c0_0] : memref<40x32xf32, #tpu.memory_space<vmem>>, vector<40x32xf32>
    %c0_1 = arith.constant 0 : index
    %c0_2 = arith.constant 0 : index
    %1 = vector.load %arg3[%c0_1, %c0_2] : memref<32x128xf32, #tpu.memory_space<vmem>>, vector<32x128xf32>
    %cst = arith.constant dense<0.000000e+00> : vector<40x128xf32>
    %2 = tpu.matmul %0, %1, %cst {dimension_numbers = #tpu.dot_dimension_numbers<[1], [0], [0], [1], [0, 0, 1, 1], [], []>} : vector<40x32xf32>, vector<32x128xf32>, vector<40x128xf32> -> vector<40x128xf32>
    %c0_3 = arith.constant 0 : index
    %c0_4 = arith.constant 0 : index
    %3 = vector.load %arg4[%c0_3, %c0_4] : memref<1x128xf32, #tpu.memory_space<vmem>>, vector<1x128xf32>
    %4 = vector.broadcast %3 : vector<1x128xf32> to vector<40x128xf32>
    %5 = arith.addf %2, %4 : vector<40x128xf32>
    %cst_5 = arith.constant 5.000000e-01 : f32
    %6 = vector.broadcast %cst_5 : f32 to vector<40x128xf32>
    %7 = arith.mulf %6, %5 : vector<40x128xf32>
    %8 = arith.mulf %5, %5 : vector<40x128xf32>
    %9 = arith.mulf %8, %5 : vector<40x128xf32>
    %cst_6 = arith.constant 4.471500e-02 : f32
    %10 = vector.broadcast %cst_6 : f32 to vector<40x128xf32>
    %11 = arith.mulf %10, %9 : vector<40x128xf32>
    %12 = arith.addf %5, %11 : vector<40x128xf32>
    %cst_7 = arith.constant 0.797884583 : f32
    %13 = vector.broadcast %cst_7 : f32 to vector<40x128xf32>
    %14 = arith.mulf %13, %12 : vector<40x128xf32>
    %15 = math.tanh %14 : vector<40x128xf32>
    %cst_8 = arith.constant 1.000000e+00 : f32
    %16 = vector.broadcast %cst_8 : f32 to vector<40x128xf32>
    %17 = arith.addf %16, %15 : vector<40x128xf32>
    %18 = arith.mulf %7, %17 : vector<40x128xf32>
    %c0_9 = arith.constant 0 : index
    %c0_10 = arith.constant 0 : index
    %19 = vector.load %arg5[%c0_9, %c0_10] : memref<128x32xf32, #tpu.memory_space<vmem>>, vector<128x32xf32>
    %cst_11 = arith.constant dense<0.000000e+00> : vector<40x32xf32>
    %20 = tpu.matmul %18, %19, %cst_11 {dimension_numbers = #tpu.dot_dimension_numbers<[1], [0], [0], [1], [0, 0, 1, 1], [], []>} : vector<40x128xf32>, vector<128x32xf32>, vector<40x32xf32> -> vector<40x32xf32>
    %c0_12 = arith.constant 0 : index
    %c0_13 = arith.constant 0 : index
    %21 = vector.load %arg6[%c0_12, %c0_13] : memref<1x32xf32, #tpu.memory_space<vmem>>, vector<1x32xf32>
    %22 = vector.broadcast %21 : vector<1x32xf32> to vector<40x32xf32>
    %23 = arith.addf %20, %22 : vector<40x32xf32>
    %c0_14 = arith.constant 0 : index
    %c0_15 = arith.constant 0 : index
    %24 = vector.load %arg7[%c0_14, %c0_15] : memref<40x32xf32, #tpu.memory_space<vmem>>, vector<40x32xf32>
    tpu.vector_store %arg7[%c0_14, %c0_15], %23 {strides = array<i32>} : memref<40x32xf32, #tpu.memory_space<vmem>>, vector<40x32xf32>,
    return
  }
  func.func @transform_0(%arg0: i32, %arg1: i32) -> (i32, i32) {
    %c0_i32 = arith.constant 0 : i32
    %c0_i32_0 = arith.constant 0 : i32
    return %arg0, %c0_i32 : i32, i32
  }
  func.func @transform_1(%arg0: i32, %arg1: i32) -> (i32, i32) {
    %c0_i32 = arith.constant 0 : i32
    %c0_i32_0 = arith.constant 0 : i32
    return %c0_i32, %arg1 : i32, i32
  }
  func.func @transform_2(%arg0: i32, %arg1: i32) -> (i32, i32) {
    %c0_i32 = arith.constant 0 : i32
    %c0_i32_0 = arith.constant 0 : i32
    return %c0_i32, %arg1 : i32, i32
  }
  func.func @transform_3(%arg0: i32, %arg1: i32) -> (i32, i32) {
    %c0_i32 = arith.constant 0 : i32
    %c0_i32_0 = arith.constant 0 : i32
    return %arg1, %c0_i32 : i32, i32
  }
  func.func @transform_4(%arg0: i32, %arg1: i32) -> (i32, i32) {
    %c0_i32 = arith.constant 0 : i32
    %c0_i32_0 = arith.constant 0 : i32
    %c0_i32_1 = arith.constant 0 : i32
    return %c0_i32, %c0_i32_0 : i32, i32
  }
  func.func @transform_5(%arg0: i32, %arg1: i32) -> (i32, i32) {
    %c0_i32 = arith.constant 0 : i32
    %c0_i32_0 = arith.constant 0 : i32
    return %arg0, %c0_i32 : i32, i32
  }
}

</mosaic_0001>

<bundles_post_ra>
// kernel: tpu_custom_call.1
= control target key start
LH: loop header
LB: loop body
LE: loop exit
PB: predicated region body
PF: predicated region fallthrough
CT: control target
= control target key end

     0   :  { %vm33_vm0 = vcmask 261120   ;;  %s372_s1 = inlined_call_operand.vmem [shape: f32[32,128], index: 1, kind: input, shape index: {}]   ;;  %s373_s0 = inlined_call_operand.vmem [shape: f32[40,32], index: 0, kind: input, shape index: {}]   ;;  %s374_s2 = inlined_call_operand.vmem [shape: f32[1,128], index: 2, kind: input, shape index: {}]   ;;  %s375_s3 = inlined_call_operand.vmem [shape: f32[128,32], index: 3, kind: input, shape index: {}]   ;;  %s376_s4 = inlined_call_operand.vmem [shape: f32[1,32], index: 4, kind: input, shape index: {}]   ;;  %s377_s5 = inlined_call_operand.vmem [shape: f32[40,32], index: 5, kind: output, shape index: {}]  }
   0x1   :  { %v28_v0 = vld [vmem:[%s372_s1 + $0x18] sm:$0xff]  ;;  %v27_v1 = vld [vmem:[%s372_s1 + $0x10] sm:$0xff]  ;;  %v26_v2 = vld [vmem:[%s372_s1 + $0x8] sm:$0xff] }
   0x2   :  { %61 = vmatpush.msra.mxu0 %v28_v0  ;;  %v25_v3 = vld [vmem:[%s372_s1] sm:$0xff]  ;;  %v141_v5 = vld [vmem:[%s375_s3 + $0x78] sm:$0xff]  ;;  %v140_v6 = vld [vmem:[%s375_s3 + $0x70] sm:$0xff] }
   0x3   :  { %v20_v4 = vld [vmem:[%s373_s0] sm:$0xff]  ;;  %146 = vmatpush.msra.mxu1 %v141_v5  ;;  %192 = vmatpush.msra.mxu2 %v141_v5  ;;  %v139_v7 = vld [vmem:[%s375_s3 + $0x68] sm:$0xff]  ;;  %v22_v10 = vld [vmem:[%s373_s0 + $0x10] sm:$0xff] }
   0x4   :  { %62 = vmatpush.msra.mxu0 %v27_v1  ;;  %193 = vmatpush.msra.mxu3 %v141_v5  ;;  %v138_v8 = vld [vmem:[%s375_s3 + $0x60] sm:$0xff]  ;;  %v21_v9 = vld [vmem:[%s373_s0 + $0x8] sm:$0xff]  ;;  %v23_v11 = vld [vmem:[%s373_s0 + $0x18] sm:$0xff] }
   0x5   :  { %147 = vmatpush.msra.mxu1 %v140_v6  ;;  %194 = vmatpush.msra.mxu2 %v140_v6  ;;  %v24_v12 = vld [vmem:[%s373_s0 + $0x20] sm:$0xff]  ;;  %v137_v13 = vld [vmem:[%s375_s3 + $0x58] sm:$0xff]  ;;  %v136_v14 = vld [vmem:[%s375_s3 + $0x50] sm:$0xff] }
   0x6   :  { %63 = vmatpush.msra.mxu0 %v26_v2  ;;  %195 = vmatpush.msra.mxu3 %v140_v6  ;;  %v135_v15 = vld [vmem:[%s375_s3 + $0x48] sm:$0xff]  ;;  %v134_v16 = vld [vmem:[%s375_s3 + $0x40] sm:$0xff]  ;;  %v133_v17 = vld [vmem:[%s375_s3 + $0x38] sm:$0xff] }
   0x7   :  { %148 = vmatpush.msra.mxu1 %v139_v7  ;;  %196 = vmatpush.msra.mxu2 %v139_v7  ;;  %v132_v18 = vld [vmem:[%s375_s3 + $0x30] sm:$0xff]  ;;  %v131_v19 = vld [vmem:[%s375_s3 + $0x28] sm:$0xff]  ;;  %v130_v20 = vld [vmem:[%s375_s3 + $0x20] sm:$0xff] }
   0x8   :  { %64 = vmatpush.msra.mxu0 %v25_v3  ;;  %197 = vmatpush.msra.mxu3 %v139_v7  ;;  %v129_v21 = vld [vmem:[%s375_s3 + $0x18] sm:$0xff]  ;;  %v128_v22 = vld [vmem:[%s375_s3 + $0x10] sm:$0xff]  ;;  %v127_v23 = vld [vmem:[%s375_s3 + $0x8] sm:$0xff] }
   0x9   :  { %187 = vmatmul.msk.f32.vlgmr.msra.gmra.mxu0 %vm33_vm0, %v20_v4  ;;  %149 = vmatpush.msra.mxu1 %v138_v8  ;;  %v126_v24 = vld [vmem:[%s375_s3] sm:$0xff] }
   0xa   :  { %198 = vmatpush.msra.mxu2 %v138_v8  ;;  %199 = vmatpush.msra.mxu3 %v138_v8  ;;  %v224_v25 = vld [vmem:[%s374_s2] ss:$0 sm:$0xff] }
   0xb   :  { %150 = vmatpush.msra.mxu1 %v137_v13 }
   0xc   :  { %200 = vmatpush.msra.mxu2 %v137_v13  ;;  %201 = vmatpush.msra.mxu3 %v137_v13 }
   0xd   :  { %151 = vmatpush.msra.mxu1 %v136_v14 }
   0xe   :  { %202 = vmatpush.msra.mxu2 %v136_v14  ;;  %203 = vmatpush.msra.mxu3 %v136_v14 }
   0xf   :  { %152 = vmatpush.msra.mxu1 %v135_v15 }
  0x10   :  { %204 = vmatpush.msra.mxu2 %v135_v15  ;;  %205 = vmatpush.msra.mxu3 %v135_v15 }
  0x11   :  { %188 = vmatmul.msk.f32.gmra.mxu0 %vm33_vm0, %v21_v9  ;;  %153 = vmatpush.msra.mxu1 %v134_v16 }
  0x12   :  { %206 = vmatpush.msra.mxu2 %v134_v16  ;;  %207 = vmatpush.msra.mxu3 %v134_v16 }
  0x13   :  { %154 = vmatpush.msra.mxu1 %v133_v17 }
  0x14   :  { %208 = vmatpush.msra.mxu2 %v133_v17  ;;  %209 = vmatpush.msra.mxu3 %v133_v17  ;;  %v225_v17 = vld [vmem:[%s376_s4] ss:$0 sm:$0xff] }
  0x15   :  { %155 = vmatpush.msra.mxu1 %v132_v18 }
  0x16   :  { %210 = vmatpush.msra.mxu2 %v132_v18  ;;  %211 = vmatpush.msra.mxu3 %v132_v18 }
  0x17   :  { %156 = vmatpush.msra.mxu1 %v131_v19 }
  0x18   :  { %212 = vmatpush.msra.mxu2 %v131_v19  ;;  %213 = vmatpush.msra.mxu3 %v131_v19 }
  0x19   :  { %189 = vmatmul.msk.f32.gmra.mxu0 %vm33_vm0, %v22_v10  ;;  %157 = vmatpush.msra.mxu1 %v130_v20 }
  0x1a   :  { %214 = vmatpush.msra.mxu2 %v130_v20  ;;  %215 = vmatpush.msra.mxu3 %v130_v20 }
  0x1b   :  { %158 = vmatpush.msra.mxu1 %v129_v21 }
  0x1c   :  { %216 = vmatpush.msra.mxu2 %v129_v21  ;;  %217 = vmatpush.msra.mxu3 %v129_v21 }
  0x1d   :  { %159 = vmatpush.msra.mxu1 %v128_v22 }
  0x1e   :  { %218 = vmatpush.msra.mxu2 %v128_v22  ;;  %219 = vmatpush.msra.mxu3 %v128_v22 }
  0x1f   :  { %160 = vmatpush.msra.mxu1 %v127_v23 }
  0x20   :  { %220 = vmatpush.msra.mxu2 %v127_v23  ;;  %221 = vmatpush.msra.mxu3 %v127_v23 }
  0x21   :  { %190 = vmatmul.msk.f32.gmra.mxu0 %vm33_vm0, %v23_v11  ;;  %161 = vmatpush.msra.mxu1 %v126_v24 }
  0x22   :  { %222 = vmatpush.msra.mxu2 %v126_v24  ;;  %223 = vmatpush.msra.mxu3 %v126_v24 }
  0x29   :  { %191 = vmatmul.msk.f32.gmra.mxu0 %vm33_vm0, %v24_v12 }
  0x86   :  { %v66_v26 = vpop.f32.mrf.mxu0 }
  0x87   :  { %v67_v27 = vadd.f32 %v224_v25, %v66_v26 }
  0x89   :  { %v86_v28 = vmul.f32 %v67_v27, %v67_v27  ;;  %v81_v44 = vmul.f32 0.5, %v67_v27 }
  0x8b   :  { %v91_v29 = vmul.f32 %v86_v28, %v67_v27 }
  0x8d   :  { %v96_v30 = vmul.f32 0.044715, %v91_v29 }
  0x8e   :  { %v69_v31 = vpop.f32.mrf.mxu0 }
  0x8f   :  { %v70_v32 = vadd.f32 %v224_v25, %v69_v31  ;;  %v101_v33 = vadd.f32 %v96_v30, %v67_v27 }
  0x91   :  { %v87_v34 = vmul.f32 %v70_v32, %v70_v32  ;;  %v106_v35 = vmul.f32 0.7978846, %v101_v33  ;;  %v82_v55 = vmul.f32 0.5, %v70_v32 }
  0x93   :  { %v92_v36 = vmul.f32 %v87_v34, %v70_v32  ;;  %226 = vtanh.f32 %v106_v35 }
  0x95   :  { %v97_v37 = vmul.f32 0.044715, %v92_v36 }
  0x96   :  { %v72_v38 = vpop.f32.mrf.mxu0 }
  0x97   :  { %v73_v39 = vadd.f32 %v224_v25, %v72_v38  ;;  %v102_v40 = vadd.f32 %v97_v37, %v70_v32 }
  0x99   :  { %v227_v41 = vpop.eup %226  ;;  %v88_v42 = vmul.f32 %v73_v39, %v73_v39  ;;  %v107_v43 = vmul.f32 0.7978846, %v102_v40  ;;  %v83_v2 = vmul.f32 0.5, %v73_v39 }
  0x9a   :  { %v116_v45 = vadd.f32 1.0, %v227_v41 }
  0x9b   :  { %v93_v46 = vmul.f32 %v88_v42, %v73_v39  ;;  %228 = vtanh.f32 %v107_v43 }
  0x9c   :  { %v121_v47 = vmul.f32 %v116_v45, %v81_v44 }
  0x9d   :  { %v98_v48 = vmul.f32 0.044715, %v93_v46 }
  0x9e   :  { %v75_v49 = vpop.f32.mrf.mxu0  ;;  %162 = vmatmul.f32.vlgmr.msra.gmra.mxu1 %v121_v47 }
  0x9f   :  { %v76_v50 = vadd.f32 %v224_v25, %v75_v49  ;;  %v103_v51 = vadd.f32 %v98_v48, %v73_v39 }
  0xa1   :  { %v229_v52 = vpop.eup %228  ;;  %v89_v53 = vmul.f32 %v76_v50, %v76_v50  ;;  %v108_v54 = vmul.f32 0.7978846, %v103_v51  ;;  %v84_v10 = vmul.f32 0.5, %v76_v50 }
  0xa2   :  { %v117_v56 = vadd.f32 1.0, %v229_v52 }
  0xa3   :  { %v94_v57 = vmul.f32 %v89_v53, %v76_v50  ;;  %230 = vtanh.f32 %v108_v54 }
  0xa4   :  { %v122_v58 = vmul.f32 %v117_v56, %v82_v55 }
  0xa5   :  { %v99_v59 = vmul.f32 0.044715, %v94_v57 }
  0xa6   :  { %v78_v60 = vpop.f32.mrf.mxu0  ;;  %165 = vmatmul.f32.vlgmr.msra.gmra.mxu2 %v122_v58 }
  0xa7   :  { %v79_v61 = vadd.f32 %v224_v25, %v78_v60  ;;  %v104_v62 = vadd.f32 %v99_v59, %v76_v50 }
  0xa9   :  { %v231_v63 = vpop.eup %230  ;;  %v90_v0 = vmul.f32 %v79_v61, %v79_v61  ;;  %v109_v1 = vmul.f32 0.7978846, %v104_v62  ;;  %v85_v14 = vmul.f32 0.5, %v79_v61 }
  0xaa   :  { %v118_v3 = vadd.f32 1.0, %v231_v63 }
  0xab   :  { %v95_v4 = vmul.f32 %v90_v0, %v79_v61  ;;  %232 = vtanh.f32 %v109_v1 }
  0xac   :  { %v123_v5 = vmul.f32 %v118_v3, %v83_v2 }
  0xad   :  { %v100_v6 = vmul.f32 0.044715, %v95_v4 }
  0xae   :  { %168 = vmatmul.f32.gmra.mxu2 %v123_v5 }
  0xaf   :  { %v105_v7 = vadd.f32 %v100_v6, %v79_v61 }
  0xb1   :  { %v233_v8 = vpop.eup %232  ;;  %v110_v9 = vmul.f32 0.7978846, %v105_v7 }
  0xb2   :  { %v119_v11 = vadd.f32 1.0, %v233_v8 }
  0xb3   :  { %234 = vtanh.f32 %v110_v9 }
  0xb4   :  { %v124_v12 = vmul.f32 %v119_v11, %v84_v10 }
  0xb6   :  { %171 = vmatmul.f32.vlgmr.msra.gmra.mxu3 %v124_v12 }
  0xb9   :  { %v235_v13 = vpop.eup %234 }
  0xba   :  { %v120_v15 = vadd.f32 1.0, %v235_v13 }
  0xbc   :  { %v125_v16 = vmul.f32 %v120_v15, %v85_v14 }
  0xbe   :  { %174 = vmatmul.f32.gmra.mxu3 %v125_v16 }
 0x11b   :  { %v163_v18 = vpop.f32.mrf.mxu1 }
 0x11c   :  { %v164_v19 = vadd.f32 %v225_v17, %v163_v18 }
 0x11e   :  { %178 = vst.msk [vmem:[%s377_s5] sm:$0xff] %vm33_vm0, %v164_v19 }
 0x129   :  { %v166_v20 = vpop.f32.mrf.mxu2 }
 0x12a   :  { %v167_v21 = vadd.f32 %v225_v17, %v166_v20 }
 0x12c   :  { %179 = vst.msk [vmem:[%s377_s5 + $0x8] sm:$0xff] %vm33_vm0, %v167_v21 }
 0x131   :  { %v169_v22 = vpop.f32.mrf.mxu2 }
 0x132   :  { %v170_v23 = vadd.f32 %v225_v17, %v169_v22 }
 0x134   :  { %180 = vst.msk [vmem:[%s377_s5 + $0x10] sm:$0xff] %vm33_vm0, %v170_v23 }
 0x139   :  { %v172_v24 = vpop.f32.mrf.mxu3 }
 0x13a   :  { %v173_v25 = vadd.f32 %v225_v17, %v172_v24 }
 0x13c   :  { %181 = vst.msk [vmem:[%s377_s5 + $0x18] sm:$0xff] %vm33_vm0, %v173_v25 }
 0x141   :  { %v175_v26 = vpop.f32.mrf.mxu3 }
 0x142   :  { %v176_v27 = vadd.f32 %v225_v17, %v175_v26 }
 0x144   :  { %182 = vst.msk [vmem:[%s377_s5 + $0x20] sm:$0xff] %vm33_vm0, %v176_v27 }

</bundles_post_ra>
